<compile_context>
chip_gen: v5e
topology: v5e:2x2
jax: 0.10.0
libtpu: 0.0.40
codegen_flags: <defaults>
</compile_context>

<pallas_src>
import functools

import jax
import jax.numpy as jnp
from jax.experimental import pallas as pl
from jax.experimental.pallas import tpu as pltpu


def _round_up(x, m):
    return ((x + m - 1) // m) * m


def _mlp_kernel(x_ref, *refs):
    """Fused MLP forward. refs = (w0, b0, w1, b1, ..., wL, bL, o_ref)."""
    o_ref = refs[-1]
    param_refs = refs[:-1]
    n_layers = len(param_refs) // 2

    h = x_ref[...]                                   # (tile, K0) in compute dtype
    for i in range(n_layers):
        w = param_refs[2 * i][...]                   # (K, N) compute dtype
        b = param_refs[2 * i + 1][...]               # (1, N) f32
        acc = jnp.dot(h, w, preferred_element_type=jnp.float32) + b
        if i < n_layers - 1:                         # hidden layers: ReLU
            h = jnp.maximum(acc, 0.0).astype(x_ref.dtype)
        else:                                        # output layer: no activation
            o_ref[...] = acc.astype(o_ref.dtype)


def policy_model_forward(x, params, *, batch_tile=256,
                         compute_dtype=jnp.bfloat16, lane=128):
    """params: list of (w, b), w shaped [in, out], b shaped [1, out] (f32).

    Returns f32 [batch, output_dim], numerically matching the PyTorch forward
    (up to compute_dtype rounding of the matmul operands)."""
    batch, input_dim = x.shape
    dims = [input_dim] + [w.shape[1] for (w, _) in params]
    output_dim = dims[-1]

    # --- lane-dense padding of all feature dims (zero padding keeps math exact)
    pdims = [_round_up(d, lane) for d in dims]
    padded_params = []
    for li, (w, b) in enumerate(params):
        pin, pout = pdims[li], pdims[li + 1]
        wp = jnp.zeros((pin, pout), compute_dtype)
        wp = wp.at[: w.shape[0], : w.shape[1]].set(w.astype(compute_dtype))
        bp = jnp.zeros((1, pout), jnp.float32)
        bp = bp.at[:, : b.shape[1]].set(b.astype(jnp.float32))
        padded_params.append((wp, bp))

    # --- batch tiling: tile multiple of 8 (f32/bf16 sublane tiling), pad batch
    batch_tile = max(8, (int(batch_tile) // 8) * 8)
    tile = min(batch_tile, _round_up(batch, 8))
    padded_batch = _round_up(batch, tile)
    xp = jnp.zeros((padded_batch, pdims[0]), compute_dtype)
    xp = xp.at[:batch, :input_dim].set(x.astype(compute_dtype))

    grid = (padded_batch // tile,)

    in_specs = [pl.BlockSpec((tile, pdims[0]), lambda i: (i, 0))]
    flat_params = []
    for (wp, bp) in padded_params:
        # Grid-invariant -> single-buffered (no 2x VMEM for resident weights).
        in_specs.append(pl.BlockSpec(wp.shape, lambda i: (0, 0),
                                     pipeline_mode=pl.Buffered(1)))
        in_specs.append(pl.BlockSpec(bp.shape, lambda i: (0, 0),
                                     pipeline_mode=pl.Buffered(1)))
        flat_params.extend([wp, bp])

    out_spec = pl.BlockSpec((tile, pdims[-1]), lambda i: (i, 0))

    # --- explicit VMEM budget (weights single-buffered, I/O tiles double-buffered)
    dt_bytes = jnp.dtype(compute_dtype).itemsize
    weight_bytes = sum(pdims[i] * pdims[i + 1] for i in range(len(pdims) - 1)) * dt_bytes
    bias_bytes = sum(pdims[1:]) * 4
    io_bytes = 2 * tile * (pdims[0] * dt_bytes + pdims[-1] * 4)
    act_bytes = 4 * tile * max(pdims) * 4
    budget = weight_bytes + bias_bytes + io_bytes + act_bytes
    vmem_limit = max(32 * 1024 * 1024,
                     min(int(1.5 * budget) + (1 << 20), 96 * 1024 * 1024))

    out_padded = pl.pallas_call(
        _mlp_kernel,
        out_shape=jax.ShapeDtypeStruct((padded_batch, pdims[-1]), jnp.float32),
        grid_spec=pltpu.PrefetchScalarGridSpec(
            num_scalar_prefetch=0,
            grid=grid,
            in_specs=in_specs,
            out_specs=out_spec,
        ),
        compiler_params=pltpu.CompilerParams(
            dimension_semantics=("parallel",),
            vmem_limit_bytes=vmem_limit),
    )(xp, *flat_params)

    # Slice off batch padding and padded (zero) action columns.  NOTE: if a
    # consumer ever argmaxes over the *padded* output, the padded columns must
    # be masked to -inf first — here we simply slice them away.
    return out_padded[:batch, :output_dim]


# jit the whole wrapper: padding / slicing fuse with the custom call and per-op
# dispatch overhead disappears.  Tiling knobs are static.
policy_model_forward_jit = jax.jit(
    policy_model_forward, static_argnames=("batch_tile", "compute_dtype", "lane"))


def init_policy_model_params(key, input_dim, width, output_dim, num_layers):
    """Deterministic init matching PyTorch nn.Linear default
    (U(-1/sqrt(fan_in), 1/sqrt(fan_in))).  Weights returned as [in, out]."""
    dims = [input_dim] + [width] * (num_layers - 1) + [output_dim]
    params = []
    for li in range(len(dims) - 1):
        fan_in, fan_out = dims[li], dims[li + 1]
        key, kw, kb = jax.random.split(key, 3)
        bound = 1.0 / jnp.sqrt(jnp.float32(fan_in))
        w = jax.random.uniform(kw, (fan_in, fan_out), jnp.float32, -bound, bound)
        b = jax.random.uniform(kb, (1, fan_out), jnp.float32, -bound, bound)
        params.append((w, b))
    return params


def policy_model_reference(x, params):
    """Pure-JAX f32 reference of the PyTorch forward."""
    h = x
    for i, (w, b) in enumerate(params):
        h = h @ w + b
        if i < len(params) - 1:
            h = jnp.maximum(h, 0.0)
    return h


if __name__ == "__main__":
    # Small shapes consistent with the module's forward.
    batch, input_dim, width, output_dim, num_layers = 8, 16, 32, 4, 4

    key = jax.random.PRNGKey(0)
    key, kx = jax.random.split(key)
    x = jax.random.normal(kx, (batch, input_dim), jnp.float32)
    params = init_policy_model_params(key, input_dim, width, output_dim, num_layers)
    ref = policy_model_reference(x, params)

    # 1) f32 compute path — tight check of kernel math (padding, tiling, bias, ReLU).
    out_f32 = jax.block_until_ready(
        policy_model_forward_jit(x, params, compute_dtype=jnp.float32))
    assert out_f32.shape == (batch, output_dim)
    assert jnp.allclose(out_f32, ref, atol=1e-4, rtol=1e-4), "f32 mismatch vs reference"

    # 2) default bf16 (performance) path — loose tolerance vs f32 reference.
    out_bf16 = jax.block_until_ready(policy_model_forward_jit(x, params))
    assert out_bf16.shape == (batch, output_dim)
    assert jnp.allclose(out_bf16, ref, atol=1e-1, rtol=5e-2), "bf16 mismatch vs reference"

    # 3) larger, non-multiple batch: exercises the 256-row tile, batch padding,
    #    and a multi-step "parallel" grid (2 steps -> both TCs on v7x).
    batch2 = 500
    key, kx2 = jax.random.split(key)
    x2 = jax.random.normal(kx2, (batch2, input_dim), jnp.float32)
    out2 = jax.block_until_ready(
        policy_model_forward_jit(x2, params, batch_tile=256))
    ref2 = policy_model_reference(x2, params)
    assert out2.shape == (batch2, output_dim)
    assert jnp.allclose(out2, ref2, atol=1e-1, rtol=5e-2), "large-batch mismatch"

    print("KERNEL_OK")
</pallas_src>

<mosaic_0001>
module attributes {stable_mosaic.version = 11 : i64} {
  func.func @_mlp_kernel(%arg0: i32, %arg1: memref<8x128xf32, #tpu.memory_space<vmem>>, %arg2: memref<128x128xf32, #tpu.memory_space<vmem>>, %arg3: memref<1x128xf32, #tpu.memory_space<vmem>>, %arg4: memref<128x128xf32, #tpu.memory_space<vmem>>, %arg5: memref<1x128xf32, #tpu.memory_space<vmem>>, %arg6: memref<128x128xf32, #tpu.memory_space<vmem>>, %arg7: memref<1x128xf32, #tpu.memory_space<vmem>>, %arg8: memref<128x128xf32, #tpu.memory_space<vmem>>, %arg9: memref<1x128xf32, #tpu.memory_space<vmem>>, %arg10: memref<8x128xf32, #tpu.memory_space<vmem>>) attributes {dimension_semantics = [#tpu.dimension_semantics<parallel>], iteration_bounds = array<i64: 1>, scalar_prefetch = 0 : i64, scratch_operands = 0 : i64, tpu.core_type = #tpu.core_type<tc>, window_params = [{transform_indices = @transform_0, window_bounds = array<i64: 8, 128>}, {pipeline_mode = #tpu.pipeline_mode<synchronous>, transform_indices = @transform_1, window_bounds = array<i64: 128, 128>}, {pipeline_mode = #tpu.pipeline_mode<synchronous>, transform_indices = @transform_2, window_bounds = array<i64: 1, 128>}, {pipeline_mode = #tpu.pipeline_mode<synchronous>, transform_indices = @transform_3, window_bounds = array<i64: 128, 128>}, {pipeline_mode = #tpu.pipeline_mode<synchronous>, transform_indices = @transform_4, window_bounds = array<i64: 1, 128>}, {pipeline_mode = #tpu.pipeline_mode<synchronous>, transform_indices = @transform_5, window_bounds = array<i64: 128, 128>}, {pipeline_mode = #tpu.pipeline_mode<synchronous>, transform_indices = @transform_6, window_bounds = array<i64: 1, 128>}, {pipeline_mode = #tpu.pipeline_mode<synchronous>, transform_indices = @transform_7, window_bounds = array<i64: 128, 128>}, {pipeline_mode = #tpu.pipeline_mode<synchronous>, transform_indices = @transform_8, window_bounds = array<i64: 1, 128>}, {transform_indices = @transform_9, window_bounds = array<i64: 8, 128>}]} {
    %c0 = arith.constant 0 : index
    %c0_0 = arith.constant 0 : index
    %0 = vector.load %arg1[%c0, %c0_0] : memref<8x128xf32, #tpu.memory_space<vmem>>, vector<8x128xf32>
    %c0_1 = arith.constant 0 : index
    %c0_2 = arith.constant 0 : index
    %1 = vector.load %arg2[%c0_1, %c0_2] : memref<128x128xf32, #tpu.memory_space<vmem>>, vector<128x128xf32>
    %c0_3 = arith.constant 0 : index
    %c0_4 = arith.constant 0 : index
    %2 = vector.load %arg3[%c0_3, %c0_4] : memref<1x128xf32, #tpu.memory_space<vmem>>, vector<1x128xf32>
    %cst = arith.constant dense<0.000000e+00> : vector<8x128xf32>
    %3 = tpu.matmul %0, %1, %cst {dimension_numbers = #tpu.dot_dimension_numbers<[1], [0], [0], [1], [0, 0, 1, 1], [], []>} : vector<8x128xf32>, vector<128x128xf32>, vector<8x128xf32> -> vector<8x128xf32>
    %4 = vector.broadcast %2 : vector<1x128xf32> to vector<8x128xf32>
    %5 = arith.addf %3, %4 : vector<8x128xf32>
    %cst_5 = arith.constant 0.000000e+00 : f32
    %6 = vector.broadcast %cst_5 : f32 to vector<8x128xf32>
    %7 = arith.maximumf %5, %6 : vector<8x128xf32>
    %c0_6 = arith.constant 0 : index
    %c0_7 = arith.constant 0 : index
    %8 = vector.load %arg4[%c0_6, %c0_7] : memref<128x128xf32, #tpu.memory_space<vmem>>, vector<128x128xf32>
    %c0_8 = arith.constant 0 : index
    %c0_9 = arith.constant 0 : index
    %9 = vector.load %arg5[%c0_8, %c0_9] : memref<1x128xf32, #tpu.memory_space<vmem>>, vector<1x128xf32>
    %cst_10 = arith.constant dense<0.000000e+00> : vector<8x128xf32>
    %10 = tpu.matmul %7, %8, %cst_10 {dimension_numbers = #tpu.dot_dimension_numbers<[1], [0], [0], [1], [0, 0, 1, 1], [], []>} : vector<8x128xf32>, vector<128x128xf32>, vector<8x128xf32> -> vector<8x128xf32>
    %11 = vector.broadcast %9 : vector<1x128xf32> to vector<8x128xf32>
    %12 = arith.addf %10, %11 : vector<8x128xf32>
    %cst_11 = arith.constant 0.000000e+00 : f32
    %13 = vector.broadcast %cst_11 : f32 to vector<8x128xf32>
    %14 = arith.maximumf %12, %13 : vector<8x128xf32>
    %c0_12 = arith.constant 0 : index
    %c0_13 = arith.constant 0 : index
    %15 = vector.load %arg6[%c0_12, %c0_13] : memref<128x128xf32, #tpu.memory_space<vmem>>, vector<128x128xf32>
    %c0_14 = arith.constant 0 : index
    %c0_15 = arith.constant 0 : index
    %16 = vector.load %arg7[%c0_14, %c0_15] : memref<1x128xf32, #tpu.memory_space<vmem>>, vector<1x128xf32>
    %cst_16 = arith.constant dense<0.000000e+00> : vector<8x128xf32>
    %17 = tpu.matmul %14, %15, %cst_16 {dimension_numbers = #tpu.dot_dimension_numbers<[1], [0], [0], [1], [0, 0, 1, 1], [], []>} : vector<8x128xf32>, vector<128x128xf32>, vector<8x128xf32> -> vector<8x128xf32>
    %18 = vector.broadcast %16 : vector<1x128xf32> to vector<8x128xf32>
    %19 = arith.addf %17, %18 : vector<8x128xf32>
    %cst_17 = arith.constant 0.000000e+00 : f32
    %20 = vector.broadcast %cst_17 : f32 to vector<8x128xf32>
    %21 = arith.maximumf %19, %20 : vector<8x128xf32>
    %c0_18 = arith.constant 0 : index
    %c0_19 = arith.constant 0 : index
    %22 = vector.load %arg8[%c0_18, %c0_19] : memref<128x128xf32, #tpu.memory_space<vmem>>, vector<128x128xf32>
    %c0_20 = arith.constant 0 : index
    %c0_21 = arith.constant 0 : index
    %23 = vector.load %arg9[%c0_20, %c0_21] : memref<1x128xf32, #tpu.memory_space<vmem>>, vector<1x128xf32>
    %cst_22 = arith.constant dense<0.000000e+00> : vector<8x128xf32>
    %24 = tpu.matmul %21, %22, %cst_22 {dimension_numbers = #tpu.dot_dimension_numbers<[1], [0], [0], [1], [0, 0, 1, 1], [], []>} : vector<8x128xf32>, vector<128x128xf32>, vector<8x128xf32> -> vector<8x128xf32>
    %25 = vector.broadcast %23 : vector<1x128xf32> to vector<8x128xf32>
    %26 = arith.addf %24, %25 : vector<8x128xf32>
    %c0_23 = arith.constant 0 : index
    %c0_24 = arith.constant 0 : index
    %27 = vector.load %arg10[%c0_23, %c0_24] : memref<8x128xf32, #tpu.memory_space<vmem>>, vector<8x128xf32>
    tpu.vector_store %arg10[%c0_23, %c0_24], %26 {strides = array<i32>} : memref<8x128xf32, #tpu.memory_space<vmem>>, vector<8x128xf32>,
    return
  }
  func.func @transform_0(%arg0: i32) -> (i32, i32) {
    %c0_i32 = arith.constant 0 : i32
    %c0_i32_0 = arith.constant 0 : i32
    return %arg0, %c0_i32 : i32, i32
  }
  func.func @transform_1(%arg0: i32) -> (i32, i32) {
    %c0_i32 = arith.constant 0 : i32
    %c0_i32_0 = arith.constant 0 : i32
    %c0_i32_1 = arith.constant 0 : i32
    return %c0_i32, %c0_i32_0 : i32, i32
  }
  func.func @transform_2(%arg0: i32) -> (i32, i32) {
    %c0_i32 = arith.constant 0 : i32
    %c0_i32_0 = arith.constant 0 : i32
    %c0_i32_1 = arith.constant 0 : i32
    return %c0_i32, %c0_i32_0 : i32, i32
  }
  func.func @transform_3(%arg0: i32) -> (i32, i32) {
    %c0_i32 = arith.constant 0 : i32
    %c0_i32_0 = arith.constant 0 : i32
    %c0_i32_1 = arith.constant 0 : i32
    return %c0_i32, %c0_i32_0 : i32, i32
  }
  func.func @transform_4(%arg0: i32) -> (i32, i32) {
    %c0_i32 = arith.constant 0 : i32
    %c0_i32_0 = arith.constant 0 : i32
    %c0_i32_1 = arith.constant 0 : i32
    return %c0_i32, %c0_i32_0 : i32, i32
  }
  func.func @transform_5(%arg0: i32) -> (i32, i32) {
    %c0_i32 = arith.constant 0 : i32
    %c0_i32_0 = arith.constant 0 : i32
    %c0_i32_1 = arith.constant 0 : i32
    return %c0_i32, %c0_i32_0 : i32, i32
  }
  func.func @transform_6(%arg0: i32) -> (i32, i32) {
    %c0_i32 = arith.constant 0 : i32
    %c0_i32_0 = arith.constant 0 : i32
    %c0_i32_1 = arith.constant 0 : i32
    return %c0_i32, %c0_i32_0 : i32, i32
  }
  func.func @transform_7(%arg0: i32) -> (i32, i32) {
    %c0_i32 = arith.constant 0 : i32
    %c0_i32_0 = arith.constant 0 : i32
    %c0_i32_1 = arith.constant 0 : i32
    return %c0_i32, %c0_i32_0 : i32, i32
  }
  func.func @transform_8(%arg0: i32) -> (i32, i32) {
    %c0_i32 = arith.constant 0 : i32
    %c0_i32_0 = arith.constant 0 : i32
    %c0_i32_1 = arith.constant 0 : i32
    return %c0_i32, %c0_i32_0 : i32, i32
  }
  func.func @transform_9(%arg0: i32) -> (i32, i32) {
    %c0_i32 = arith.constant 0 : i32
    %c0_i32_0 = arith.constant 0 : i32
    return %arg0, %c0_i32 : i32, i32
  }
}

</mosaic_0001>

<bundles_post_ra>
// kernel: policy_model_forward.1
= control target key start
LH: loop header
LB: loop body
LE: loop exit
PB: predicated region body
PF: predicated region fallthrough
CT: control target
= control target key end

     0   :  { %s465_s1 = inlined_call_operand.vmem [shape: f32[128,128], index: 1, kind: input, shape index: {}]   ;;  %s466_s3 = inlined_call_operand.vmem [shape: f32[128,128], index: 3, kind: input, shape index: {}]   ;;  %s467_s2 = inlined_call_operand.vmem [shape: f32[1,128], index: 2, kind: input, shape index: {}]   ;;  %s468_s0 = inlined_call_operand.vmem [shape: f32[8,128], index: 0, kind: input, shape index: {}]   ;;  %s469_s4 = inlined_call_operand.vmem [shape: f32[1,128], index: 4, kind: input, shape index: {}]   ;;  %s470_s5 = inlined_call_operand.vmem [shape: f32[128,128], index: 5, kind: input, shape index: {}]   ;;  %s471_s6 = inlined_call_operand.vmem [shape: f32[1,128], index: 6, kind: input, shape index: {}]   ;;  %s472_s7 = inlined_call_operand.vmem [shape: f32[128,128], index: 7, kind: input, shape index: {}]   ;;  %s473_s8 = inlined_call_operand.vmem [shape: f32[1,128], index: 8, kind: input, shape index: {}]   ;;  %s474_s9 = inlined_call_operand.vmem [shape: f32[8,128], index: 9, kind: output, shape index: {}]  }
   0x1   :  { %v48_v0 = vld [vmem:[%s465_s1 + $0x78] sm:$0xff]  ;;  %v47_v1 = vld [vmem:[%s465_s1 + $0x70] sm:$0xff]  ;;  %v46_v2 = vld [vmem:[%s465_s1 + $0x68] sm:$0xff] }
   0x2   :  { %53 = vmatpush.msra.mxu0 %v48_v0  ;;  %v45_v3 = vld [vmem:[%s465_s1 + $0x60] sm:$0xff]  ;;  %v89_v4 = vld [vmem:[%s466_s3 + $0x78] sm:$0xff]  ;;  %v88_v6 = vld [vmem:[%s466_s3 + $0x70] sm:$0xff] }
   0x3   :  { %v44_v5 = vld [vmem:[%s465_s1 + $0x58] sm:$0xff]  ;;  %94 = vmatpush.msra.mxu1 %v89_v4  ;;  %v87_v7 = vld [vmem:[%s466_s3 + $0x68] sm:$0xff]  ;;  %v43_v8 = vld [vmem:[%s465_s1 + $0x50] sm:$0xff] }
   0x4   :  { %54 = vmatpush.msra.mxu0 %v47_v1  ;;  %v86_v9 = vld [vmem:[%s466_s3 + $0x60] sm:$0xff]  ;;  %v42_v10 = vld [vmem:[%s465_s1 + $0x48] sm:$0xff]  ;;  %v85_v11 = vld [vmem:[%s466_s3 + $0x58] sm:$0xff] }
   0x5   :  { %95 = vmatpush.msra.mxu1 %v88_v6  ;;  %v41_v12 = vld [vmem:[%s465_s1 + $0x40] sm:$0xff]  ;;  %v84_v13 = vld [vmem:[%s466_s3 + $0x50] sm:$0xff]  ;;  %v40_v14 = vld [vmem:[%s465_s1 + $0x38] sm:$0xff] }
   0x6   :  { %55 = vmatpush.msra.mxu0 %v46_v2  ;;  %v83_v15 = vld [vmem:[%s466_s3 + $0x48] sm:$0xff]  ;;  %v39_v16 = vld [vmem:[%s465_s1 + $0x30] sm:$0xff]  ;;  %v82_v17 = vld [vmem:[%s466_s3 + $0x40] sm:$0xff] }
   0x7   :  { %96 = vmatpush.msra.mxu1 %v87_v7  ;;  %v38_v18 = vld [vmem:[%s465_s1 + $0x28] sm:$0xff]  ;;  %v81_v19 = vld [vmem:[%s466_s3 + $0x38] sm:$0xff]  ;;  %v37_v20 = vld [vmem:[%s465_s1 + $0x20] sm:$0xff] }
   0x8   :  { %56 = vmatpush.msra.mxu0 %v45_v3  ;;  %v80_v21 = vld [vmem:[%s466_s3 + $0x30] sm:$0xff]  ;;  %v36_v22 = vld [vmem:[%s465_s1 + $0x18] sm:$0xff]  ;;  %v79_v23 = vld [vmem:[%s466_s3 + $0x28] sm:$0xff] }
   0x9   :  { %97 = vmatpush.msra.mxu1 %v86_v9  ;;  %v35_v24 = vld [vmem:[%s465_s1 + $0x10] sm:$0xff]  ;;  %v78_v25 = vld [vmem:[%s466_s3 + $0x20] sm:$0xff]  ;;  %v34_v26 = vld [vmem:[%s465_s1 + $0x8] sm:$0xff] }
   0xa   :  { %57 = vmatpush.msra.mxu0 %v44_v5  ;;  %v77_v27 = vld [vmem:[%s466_s3 + $0x18] sm:$0xff]  ;;  %v33_v28 = vld [vmem:[%s465_s1] sm:$0xff]  ;;  %v76_v30 = vld [vmem:[%s466_s3 + $0x10] sm:$0xff] }
   0xb   :  { %98 = vmatpush.msra.mxu1 %v85_v11  ;;  %v32_v29 = vld [vmem:[%s468_s0] sm:$0xff]  ;;  %v75_v31 = vld [vmem:[%s466_s3 + $0x8] sm:$0xff]  ;;  %v130_v33 = vld [vmem:[%s470_s5 + $0x78] sm:$0xff] }
   0xc   :  { %58 = vmatpush.msra.mxu0 %v43_v8  ;;  %v74_v32 = vld [vmem:[%s466_s3] sm:$0xff]  ;;  %v129_v34 = vld [vmem:[%s470_s5 + $0x70] sm:$0xff]  ;;  %135 = vmatpush.msra.mxu2 %v130_v33  ;;  %v128_v35 = vld [vmem:[%s470_s5 + $0x68] sm:$0xff] }
   0xd   :  { %99 = vmatpush.msra.mxu1 %v84_v13  ;;  %v127_v36 = vld [vmem:[%s470_s5 + $0x60] sm:$0xff]  ;;  %v126_v37 = vld [vmem:[%s470_s5 + $0x58] sm:$0xff]  ;;  %v125_v38 = vld [vmem:[%s470_s5 + $0x50] sm:$0xff] }
   0xe   :  { %59 = vmatpush.msra.mxu0 %v42_v10  ;;  %136 = vmatpush.msra.mxu2 %v129_v34  ;;  %v124_v39 = vld [vmem:[%s470_s5 + $0x48] sm:$0xff]  ;;  %v123_v40 = vld [vmem:[%s470_s5 + $0x40] sm:$0xff]  ;;  %v122_v41 = vld [vmem:[%s470_s5 + $0x38] sm:$0xff] }
   0xf   :  { %100 = vmatpush.msra.mxu1 %v83_v15  ;;  %v121_v42 = vld [vmem:[%s470_s5 + $0x30] sm:$0xff]  ;;  %v120_v43 = vld [vmem:[%s470_s5 + $0x28] sm:$0xff]  ;;  %v119_v44 = vld [vmem:[%s470_s5 + $0x20] sm:$0xff] }
  0x10   :  { %60 = vmatpush.msra.mxu0 %v41_v12  ;;  %137 = vmatpush.msra.mxu2 %v128_v35  ;;  %v118_v45 = vld [vmem:[%s470_s5 + $0x18] sm:$0xff]  ;;  %v201_v46 = vld [vmem:[%s467_s2] ss:$0 sm:$0xff]  ;;  %v117_v50 = vld [vmem:[%s470_s5 + $0x10] sm:$0xff] }
  0x11   :  { %101 = vmatpush.msra.mxu1 %v82_v17  ;;  %v116_v51 = vld [vmem:[%s470_s5 + $0x8] sm:$0xff]  ;;  %v115_v52 = vld [vmem:[%s470_s5] sm:$0xff]  ;;  %v171_v53 = vld [vmem:[%s472_s7 + $0x78] sm:$0xff] }
  0x12   :  { %61 = vmatpush.msra.mxu0 %v40_v14  ;;  %138 = vmatpush.msra.mxu2 %v127_v36  ;;  %v170_v54 = vld [vmem:[%s472_s7 + $0x70] sm:$0xff]  ;;  %v169_v55 = vld [vmem:[%s472_s7 + $0x68] sm:$0xff]  ;;  %v168_v56 = vld [vmem:[%s472_s7 + $0x60] sm:$0xff] }
  0x13   :  { %102 = vmatpush.msra.mxu1 %v81_v19  ;;  %176 = vmatpush.msra.mxu3 %v171_v53  ;;  %v167_v57 = vld [vmem:[%s472_s7 + $0x58] sm:$0xff]  ;;  %v166_v58 = vld [vmem:[%s472_s7 + $0x50] sm:$0xff]  ;;  %v165_v59 = vld [vmem:[%s472_s7 + $0x48] sm:$0xff] }
  0x14   :  { %62 = vmatpush.msra.mxu0 %v39_v16  ;;  %139 = vmatpush.msra.mxu2 %v126_v37  ;;  %v164_v60 = vld [vmem:[%s472_s7 + $0x40] sm:$0xff]  ;;  %v163_v61 = vld [vmem:[%s472_s7 + $0x38] sm:$0xff]  ;;  %v162_v62 = vld [vmem:[%s472_s7 + $0x30] sm:$0xff] }
  0x15   :  { %103 = vmatpush.msra.mxu1 %v80_v21  ;;  %177 = vmatpush.msra.mxu3 %v170_v54  ;;  %v161_v63 = vld [vmem:[%s472_s7 + $0x28] sm:$0xff]  ;;  %v160_v0 = vld [vmem:[%s472_s7 + $0x20] sm:$0xff]  ;;  %v159_v1 = vld [vmem:[%s472_s7 + $0x18] sm:$0xff] }
  0x16   :  { %63 = vmatpush.msra.mxu0 %v38_v18  ;;  %140 = vmatpush.msra.mxu2 %v125_v38  ;;  %v202_v2 = vld [vmem:[%s469_s4] ss:$0 sm:$0xff]  ;;  %v158_v6 = vld [vmem:[%s472_s7 + $0x10] sm:$0xff]  ;;  %v157_v7 = vld [vmem:[%s472_s7 + $0x8] sm:$0xff] }
  0x17   :  { %104 = vmatpush.msra.mxu1 %v79_v23  ;;  %178 = vmatpush.msra.mxu3 %v169_v55  ;;  %v156_v8 = vld [vmem:[%s472_s7] sm:$0xff] }
  0x18   :  { %64 = vmatpush.msra.mxu0 %v37_v20  ;;  %141 = vmatpush.msra.mxu2 %v124_v39  ;;  %v203_v9 = vld [vmem:[%s471_s6] ss:$0 sm:$0xff] }
  0x19   :  { %105 = vmatpush.msra.mxu1 %v78_v25  ;;  %179 = vmatpush.msra.mxu3 %v168_v56  ;;  %v204_v13 = vld [vmem:[%s473_s8] ss:$0 sm:$0xff] }
  0x1a   :  { %65 = vmatpush.msra.mxu0 %v36_v22  ;;  %142 = vmatpush.msra.mxu2 %v123_v40 }
  0x1b   :  { %106 = vmatpush.msra.mxu1 %v77_v27  ;;  %180 = vmatpush.msra.mxu3 %v167_v57 }
  0x1c   :  { %66 = vmatpush.msra.mxu0 %v35_v24  ;;  %143 = vmatpush.msra.mxu2 %v122_v41 }
  0x1d   :  { %107 = vmatpush.msra.mxu1 %v76_v30  ;;  %181 = vmatpush.msra.mxu3 %v166_v58 }
  0x1e   :  { %67 = vmatpush.msra.mxu0 %v34_v26  ;;  %144 = vmatpush.msra.mxu2 %v121_v42 }
  0x1f   :  { %108 = vmatpush.msra.mxu1 %v75_v31  ;;  %182 = vmatpush.msra.mxu3 %v165_v59 }
  0x20   :  { %68 = vmatpush.msra.mxu0 %v33_v28  ;;  %145 = vmatpush.msra.mxu2 %v120_v43 }
  0x21   :  { %69 = vmatmul.f32.vlgmr.msra.gmra.mxu0 %v32_v29  ;;  %109 = vmatpush.msra.mxu1 %v74_v32 }
  0x22   :  { %146 = vmatpush.msra.mxu2 %v119_v44  ;;  %183 = vmatpush.msra.mxu3 %v164_v60 }
  0x24   :  { %147 = vmatpush.msra.mxu2 %v118_v45  ;;  %184 = vmatpush.msra.mxu3 %v163_v61 }
  0x26   :  { %148 = vmatpush.msra.mxu2 %v117_v50  ;;  %185 = vmatpush.msra.mxu3 %v162_v62 }
  0x28   :  { %149 = vmatpush.msra.mxu2 %v116_v51  ;;  %186 = vmatpush.msra.mxu3 %v161_v63 }
  0x2a   :  { %150 = vmatpush.msra.mxu2 %v115_v52  ;;  %187 = vmatpush.msra.mxu3 %v160_v0 }
  0x2c   :  { %188 = vmatpush.msra.mxu3 %v159_v1 }
  0x2e   :  { %189 = vmatpush.msra.mxu3 %v158_v6 }
  0x30   :  { %190 = vmatpush.msra.mxu3 %v157_v7 }
  0x32   :  { %191 = vmatpush.msra.mxu3 %v156_v8 }
  0x9e   :  { %v70_v47 = vpop.f32.mrf.mxu0 }
  0x9f   :  { %v71_v48 = vadd.f32 %v201_v46, %v70_v47 }
  0xa1   :  { %v73_v49 = vmax.f32 %v71_v48, 0.0 }
  0xa3   :  { %110 = vmatmul.f32.vlgmr.msra.gmra.mxu1 %v73_v49 }
 0x120   :  { %v111_v3 = vpop.f32.mrf.mxu1 }
 0x121   :  { %v112_v4 = vadd.f32 %v202_v2, %v111_v3 }
 0x123   :  { %v114_v5 = vmax.f32 %v112_v4, 0.0 }
 0x125   :  { %151 = vmatmul.f32.vlgmr.msra.gmra.mxu2 %v114_v5 }
 0x1a8   :  { %v152_v10 = vpop.f32.mrf.mxu2 }
 0x1a9   :  { %v153_v11 = vadd.f32 %v203_v9, %v152_v10 }
 0x1ab   :  { %v155_v12 = vmax.f32 %v153_v11, 0.0 }
 0x1ad   :  { %192 = vmatmul.f32.vlgmr.msra.gmra.mxu3 %v155_v12 }
 0x230   :  { %v193_v14 = vpop.f32.mrf.mxu3 }
 0x231   :  { %v194_v15 = vadd.f32 %v204_v13, %v193_v14 }
 0x233   :  { %196 = vst [vmem:[%s474_s9] sm:$0xff] %v194_v15 }

</bundles_post_ra>
